<compile_context>
chip_gen: v5e
topology: v5e:2x2
jax: 0.10.0
libtpu: 0.0.40
codegen_flags: <defaults>
</compile_context>

<pallas_src>
import math

import jax
import jax.numpy as jnp
from jax import lax
from jax.experimental import pallas as pl
from jax.experimental.pallas import tpu as pltpu

LN_EPS = 1e-5  # PyTorch nn.LayerNorm default


def _round_up(x, m):
    return ((x + m - 1) // m) * m


def _vmem_capacity_bytes():
    """Per-chip VMEM capacity; conservative fallback if the query fails."""
    try:
        info = pltpu.get_tpu_info()
        cap = getattr(info, "vmem_capacity_bytes", None)
        if cap:
            return int(cap)
    except Exception:
        pass
    return 64 * 1024 * 1024  # v7x per-TensorCore VMEM (smallest of the fleet)


def _make_addnorm_kernel(h):
    """Kernel over a (row_tile, H) block; statistics over the full last axis."""
    inv_h = 1.0 / float(h)

    def kernel(x_ref, y_ref, gamma_ref, beta_ref, o_ref):
        # TODO(synk): training-mode dropout (stochastic mask) omitted; eval-mode
        # dropout is identity, which is what this kernel reproduces.
        s = x_ref[...].astype(jnp.float32) + y_ref[...].astype(jnp.float32)
        mean = jnp.sum(s, axis=-1, keepdims=True) * inv_h
        centered = s - mean
        var = jnp.sum(centered * centered, axis=-1, keepdims=True) * inv_h
        inv = lax.rsqrt(var + LN_EPS)
        # gamma/beta are already f32 (pre-cast in the wrapper).
        o_ref[...] = (centered * inv * gamma_ref[...] + beta_ref[...]).astype(o_ref.dtype)

    return kernel


def _pick_row_tile(rows, pack, max_tile):
    """Largest VMEM-fitting row tile; prefer one that divides `rows` exactly
    so the wrapper never has to materialize a padded HBM copy of the inputs."""
    max_tile = max(pack, (max_tile // pack) * pack)
    if rows <= max_tile:
        return _round_up(rows, pack)
    lo = max(pack, max_tile // 4)
    tile = max_tile
    scanned = 0
    while tile >= lo and scanned < 512:
        if rows % tile == 0:
            return tile
        tile -= pack
        scanned += 1
    return max_tile  # fallback: pad the row remainder


def add_norm(x, y, gamma, beta):
    """x, y: (..., H); gamma, beta: (H,). Returns LayerNorm(x + y) over H."""
    assert x.shape == y.shape, "X and Y must have the same shape"
    orig_shape = x.shape
    H = orig_shape[-1]
    rows = int(math.prod(orig_shape[:-1])) if len(orig_shape) > 1 else 1

    in_bytes = jnp.dtype(x.dtype).itemsize
    # Sublane packing: 8 rows/vreg for 4-byte dtypes, 16 for 2-byte, 32 for 1-byte.
    pack = 8 if in_bytes >= 4 else (16 if in_bytes == 2 else 32)

    cap = _vmem_capacity_bytes()
    vmem_limit = min(cap // 2, 128 * 1024 * 1024)
    buffer_budget = cap // 8
    # Per-row VMEM footprint: double-buffered x/y/out blocks plus ~4 live f32
    # elementwise intermediates inside the kernel body.
    bytes_per_row = (2 * 3 * in_bytes + 4 * 4) * H
    row_tile = _pick_row_tile(rows, pack, max(pack, buffer_budget // max(bytes_per_row, 1)))
    rows_pad = _round_up(rows, row_tile)

    x2 = x.reshape(rows, H)
    y2 = y.reshape(rows, H)
    if rows_pad != rows:
        x2 = jnp.pad(x2, ((0, rows_pad - rows), (0, 0)))
        y2 = jnp.pad(y2, ((0, rows_pad - rows), (0, 0)))
    g2 = gamma.astype(jnp.float32).reshape(1, H)
    b2 = beta.astype(jnp.float32).reshape(1, H)

    grid = (rows_pad // row_tile,)
    kernel = _make_addnorm_kernel(H)

    cost = pl.CostEstimate(
        flops=8 * rows * H,
        transcendentals=rows,
        bytes_accessed=rows * H * 3 * in_bytes,
    )

    out = pl.pallas_call(
        kernel,
        out_shape=jax.ShapeDtypeStruct((rows_pad, H), x.dtype),
        grid_spec=pltpu.PrefetchScalarGridSpec(
            num_scalar_prefetch=0,
            grid=grid,
            in_specs=[
                pl.BlockSpec((row_tile, H), lambda i: (i, 0)),
                pl.BlockSpec((row_tile, H), lambda i: (i, 0)),
                pl.BlockSpec((1, H), lambda i: (0, 0)),  # resident gamma (f32)
                pl.BlockSpec((1, H), lambda i: (0, 0)),  # resident beta  (f32)
            ],
            out_specs=pl.BlockSpec((row_tile, H), lambda i: (i, 0)),
        ),
        compiler_params=pltpu.CompilerParams(
            dimension_semantics=("parallel",),
            vmem_limit_bytes=vmem_limit,
        ),
        cost_estimate=cost,
    )(x2, y2, g2, b2)

    if rows_pad != rows:
        out = out[:rows]
    return out.reshape(orig_shape)


def add_norm_ref(x, y, gamma, beta):
    s = (x + y).astype(jnp.float32)
    mean = jnp.mean(s, axis=-1, keepdims=True)
    var = jnp.mean((s - mean) ** 2, axis=-1, keepdims=True)
    return ((s - mean) / jnp.sqrt(var + LN_EPS)) * gamma.astype(jnp.float32) + beta.astype(
        jnp.float32
    )


if __name__ == "__main__":
    key = jax.random.PRNGKey(0)

    # Case 1: module-implied small shape (H=32, not a multiple of 128 lanes).
    B, S, H = 2, 8, 32
    kx, ky = jax.random.split(key)
    x = jax.random.normal(kx, (B, S, H), dtype=jnp.float32)
    y = jax.random.normal(ky, (B, S, H), dtype=jnp.float32)
    gamma = jnp.ones((H,), dtype=jnp.float32)   # PyTorch default init
    beta = jnp.zeros((H,), dtype=jnp.float32)
    out = jax.block_until_ready(add_norm(x, y, gamma, beta))
    ref = add_norm_ref(x, y, gamma, beta)
    assert out.shape == (B, S, H)
    assert jnp.allclose(out, ref, atol=1e-5, rtol=1e-4), "mismatch vs reference (H=32)"

    # Case 2: lane-aligned hidden (H=128) with non-trivial affine params.
    B2, S2, H2 = 2, 24, 128
    k1, k2, k3, k4 = jax.random.split(key, 4)
    x2 = jax.random.normal(k1, (B2, S2, H2), dtype=jnp.float32)
    y2 = jax.random.normal(k2, (B2, S2, H2), dtype=jnp.float32)
    g2 = jax.random.normal(k3, (H2,), dtype=jnp.float32)
    b2 = jax.random.normal(k4, (H2,), dtype=jnp.float32)
    out2 = jax.block_until_ready(add_norm(x2, y2, g2, b2))
    ref2 = add_norm_ref(x2, y2, g2, b2)
    assert jnp.allclose(out2, ref2, atol=1e-5, rtol=1e-4), "mismatch vs reference (H=128)"

    # Case 3: bf16 inputs (exercises 16-row sublane packing and f32 accumulation).
    B3, S3, H3 = 2, 24, 256
    k5, k6, k7, k8 = jax.random.split(jax.random.PRNGKey(1), 4)
    x3 = jax.random.normal(k5, (B3, S3, H3), dtype=jnp.bfloat16)
    y3 = jax.random.normal(k6, (B3, S3, H3), dtype=jnp.bfloat16)
    g3 = jax.random.normal(k7, (H3,), dtype=jnp.bfloat16)
    b3 = jax.random.normal(k8, (H3,), dtype=jnp.bfloat16)
    out3 = jax.block_until_ready(add_norm(x3, y3, g3, b3))
    ref3 = add_norm_ref(x3, y3, g3, b3)
    assert jnp.allclose(out3.astype(jnp.float32), ref3, atol=3e-2, rtol=3e-2), (
        "mismatch vs reference (bf16)"
    )

    print("KERNEL_OK")
</pallas_src>

<mosaic_0001>
module attributes {stable_mosaic.version = 11 : i64} {
  func.func @kernel(%arg0: i32, %arg1: memref<16x32xf32, #tpu.memory_space<vmem>>, %arg2: memref<16x32xf32, #tpu.memory_space<vmem>>, %arg3: memref<1x32xf32, #tpu.memory_space<vmem>>, %arg4: memref<1x32xf32, #tpu.memory_space<vmem>>, %arg5: memref<16x32xf32, #tpu.memory_space<vmem>>) attributes {dimension_semantics = [#tpu.dimension_semantics<parallel>], iteration_bounds = array<i64: 1>, scalar_prefetch = 0 : i64, scratch_operands = 0 : i64, tpu.core_type = #tpu.core_type<tc>, window_params = [{transform_indices = @transform_0, window_bounds = array<i64: 16, 32>}, {transform_indices = @transform_1, window_bounds = array<i64: 16, 32>}, {pipeline_mode = #tpu.pipeline_mode<synchronous>, transform_indices = @transform_2, window_bounds = array<i64: 1, 32>}, {pipeline_mode = #tpu.pipeline_mode<synchronous>, transform_indices = @transform_3, window_bounds = array<i64: 1, 32>}, {transform_indices = @transform_4, window_bounds = array<i64: 16, 32>}]} {
    %c0 = arith.constant 0 : index
    %c0_0 = arith.constant 0 : index
    %0 = vector.load %arg1[%c0, %c0_0] : memref<16x32xf32, #tpu.memory_space<vmem>>, vector<16x32xf32>
    %c0_1 = arith.constant 0 : index
    %c0_2 = arith.constant 0 : index
    %1 = vector.load %arg2[%c0_1, %c0_2] : memref<16x32xf32, #tpu.memory_space<vmem>>, vector<16x32xf32>
    %2 = arith.addf %0, %1 : vector<16x32xf32>
    %cst = arith.constant dense<0.000000e+00> : vector<16xf32>
    %3 = vector.multi_reduction <add>, %2, %cst [1] : vector<16x32xf32> to vector<16xf32>
    %4 = vector.shape_cast %3 : vector<16xf32> to vector<16x1xf32>
    %cst_3 = arith.constant 3.125000e-02 : f32
    %5 = vector.broadcast %cst_3 : f32 to vector<16x1xf32>
    %6 = arith.mulf %4, %5 : vector<16x1xf32>
    %7 = vector.broadcast %6 : vector<16x1xf32> to vector<16x32xf32>
    %8 = arith.subf %2, %7 : vector<16x32xf32>
    %9 = arith.mulf %8, %8 : vector<16x32xf32>
    %cst_4 = arith.constant dense<0.000000e+00> : vector<16xf32>
    %10 = vector.multi_reduction <add>, %9, %cst_4 [1] : vector<16x32xf32> to vector<16xf32>
    %11 = vector.shape_cast %10 : vector<16xf32> to vector<16x1xf32>
    %cst_5 = arith.constant 3.125000e-02 : f32
    %12 = vector.broadcast %cst_5 : f32 to vector<16x1xf32>
    %13 = arith.mulf %11, %12 : vector<16x1xf32>
    %cst_6 = arith.constant 9.99999974E-6 : f32
    %14 = vector.broadcast %cst_6 : f32 to vector<16x1xf32>
    %15 = arith.addf %13, %14 : vector<16x1xf32>
    %16 = math.rsqrt %15 : vector<16x1xf32>
    %17 = vector.broadcast %16 : vector<16x1xf32> to vector<16x32xf32>
    %18 = arith.mulf %8, %17 : vector<16x32xf32>
    %c0_7 = arith.constant 0 : index
    %c0_8 = arith.constant 0 : index
    %19 = vector.load %arg3[%c0_7, %c0_8] : memref<1x32xf32, #tpu.memory_space<vmem>>, vector<1x32xf32>
    %20 = vector.broadcast %19 : vector<1x32xf32> to vector<16x32xf32>
    %21 = arith.mulf %18, %20 : vector<16x32xf32>
    %c0_9 = arith.constant 0 : index
    %c0_10 = arith.constant 0 : index
    %22 = vector.load %arg4[%c0_9, %c0_10] : memref<1x32xf32, #tpu.memory_space<vmem>>, vector<1x32xf32>
    %23 = vector.broadcast %22 : vector<1x32xf32> to vector<16x32xf32>
    %24 = arith.addf %21, %23 : vector<16x32xf32>
    %c0_11 = arith.constant 0 : index
    %c0_12 = arith.constant 0 : index
    %25 = vector.load %arg5[%c0_11, %c0_12] : memref<16x32xf32, #tpu.memory_space<vmem>>, vector<16x32xf32>
    tpu.vector_store %arg5[%c0_11, %c0_12], %24 {strides = array<i32>} : memref<16x32xf32, #tpu.memory_space<vmem>>, vector<16x32xf32>,
    return
  }
  func.func @transform_0(%arg0: i32) -> (i32, i32) {
    %c0_i32 = arith.constant 0 : i32
    %c0_i32_0 = arith.constant 0 : i32
    return %arg0, %c0_i32 : i32, i32
  }
  func.func @transform_1(%arg0: i32) -> (i32, i32) {
    %c0_i32 = arith.constant 0 : i32
    %c0_i32_0 = arith.constant 0 : i32
    return %arg0, %c0_i32 : i32, i32
  }
  func.func @transform_2(%arg0: i32) -> (i32, i32) {
    %c0_i32 = arith.constant 0 : i32
    %c0_i32_0 = arith.constant 0 : i32
    %c0_i32_1 = arith.constant 0 : i32
    return %c0_i32, %c0_i32_0 : i32, i32
  }
  func.func @transform_3(%arg0: i32) -> (i32, i32) {
    %c0_i32 = arith.constant 0 : i32
    %c0_i32_0 = arith.constant 0 : i32
    %c0_i32_1 = arith.constant 0 : i32
    return %c0_i32, %c0_i32_0 : i32, i32
  }
  func.func @transform_4(%arg0: i32) -> (i32, i32) {
    %c0_i32 = arith.constant 0 : i32
    %c0_i32_0 = arith.constant 0 : i32
    return %arg0, %c0_i32 : i32, i32
  }
}

</mosaic_0001>

<bundles_post_ra>
// kernel: tpu_custom_call.1
= control target key start
LH: loop header
LB: loop body
LE: loop exit
PB: predicated region body
PF: predicated region fallthrough
CT: control target
= control target key end

     0   :  { %9 = vsyncpa [#allocation3], 0  ;;  %s284_s0 = inlined_call_operand.hbm [shape: f32[16,32], index: 0, kind: input, shape index: {}]   ;;  %s285_s1 = inlined_call_operand.hbm [shape: f32[16,32], index: 1, kind: input, shape index: {}]   ;;  %s286_s2 = inlined_call_operand.vmem [shape: f32[1,32], index: 2, kind: input, shape index: {}]   ;;  %s287_s3 = inlined_call_operand.vmem [shape: f32[1,32], index: 3, kind: input, shape index: {}]   ;;  %s288_s4 = inlined_call_operand.hbm [shape: f32[16,32], index: 4, kind: output, shape index: {}]  }
   0x1   :  { %10 = vsyncpa [#allocation6], 0 }
   0x2   :  { %11 = vsyncpa [#allocation4], 0  ;;  %s16_s17 = sshll.u32 %s284_s0, 4  ;;  %s224_s18 = smov [#allocation2]   ;;  %s17_s17 = int_to_ptr.hbm [resolvable:$true] %s16_s17 }
   0x3   :  { %s18_s19 = sshll.u32 %s224_s18, 4  ;;  %s29_s22 = sshll.u32 %s285_s1, 4  ;;  %s19_s19 = int_to_ptr.vmem [resolvable:$true] %s18_s19  ;;  %s30_s22 = int_to_ptr.hbm [resolvable:$true] %s29_s22 }
   0x4   :  { %s225_s23 = smov 128   ;;  %s226_s24 = smov 8  }
   0x5   :  { %24 = dma.hbm_to_vmem [thread:$0]  %s17_s17, 256, %s19_s19, [#allocation3], %s225_s23, %s225_s23, %s226_s24  }
   0x6   :  { %s227_s25 = smov [#allocation5]  }
   0x7   :  { %s31_s26 = sshll.u32 %s227_s25, 4  ;;  %s32_s26 = int_to_ptr.vmem [resolvable:$true] %s31_s26 }
   0x8   :  { %37 = dma.hbm_to_vmem [thread:$0]  %s30_s22, 256, %s32_s26, [#allocation6], %s225_s23, %s225_s23, %s226_s24  }
   0x9   :  { %218 = dma.done.wait [#allocation3], 256  }
   0xa   :  { %219 = vsyncadd [#allocation3], 4294967040 }
   0xb   :  { %220 = dma.done.wait [#allocation6], 256  }
   0xc   :  { %221 = vsyncadd [#allocation6], 4294967040  ;;  %v50_v0 = vld [vmem:[#allocation2] sm:$0xff]  ;;  %v52_v1 = vld [vmem:[#allocation5] sm:$0xff]  ;;  %vm56_vm0 = vcmask 261120   ;;  %s121_s6 = sshll.u32 %s288_s4, 4  ;;  %s122_s6 = int_to_ptr.hbm [resolvable:$true] %s121_s6 }
   0xd   :  { %v54_v2 = vadd.f32 %v52_v1, %v50_v0  ;;  %v51_v3 = vld [vmem:[#allocation2 + $0x8] sm:$0xff]  ;;  %v53_v4 = vld [vmem:[#allocation5 + $0x8] sm:$0xff]  ;;  %v140_v32 = vld [vmem:[%s286_s2] ss:$0 sm:$0xff]  ;;  %s228_s2 = smov [#allocation7]  }
   0xe   :  { %v55_v6 = vadd.f32 %v53_v4, %v51_v3  ;;  %v141_v36 = vld [vmem:[%s287_s3] ss:$0 sm:$0xff]  ;;  %s119_s29 = sshll.u32 %s228_s2, 4  ;;  %s120_s29 = int_to_ptr.vmem [resolvable:$true] %s119_s29 }
   0xf   :  { %v57_v5 = vsel %vm56_vm0, %v54_v2, 0.0 }
  0x10   :  { %58 = vadd.xlane.f32.xlu0 %v57_v5  ;;  %v60_v7 = vsel %vm56_vm0, %v55_v6, 0.0 }
  0x18   :  { %61 = vadd.xlane.f32.xlu0 %v60_v7 }
  0x83   :  { %v59_v8 = vpop.xlane.xlu0 %58 }
  0x84   :  { %v63_v9 = vmul.f32 0.03125, %v59_v8 }
  0x86   :  { %v65_v10 = vsub.f32 %v54_v2, %v63_v9 }
  0x88   :  { %v67_v11 = vmul.f32 %v65_v10, %v65_v10 }
  0x8a   :  { %v69_v12 = vsel %vm56_vm0, %v67_v11, 0.0 }
  0x8b   :  { %70 = vadd.xlane.f32.xlu1 %v69_v12  ;;  %v62_v13 = vpop.xlane.xlu0 %61 }
  0x8c   :  { %v64_v14 = vmul.f32 0.03125, %v62_v13 }
  0x8e   :  { %v66_v15 = vsub.f32 %v55_v6, %v64_v14 }
  0x90   :  { %v68_v16 = vmul.f32 %v66_v15, %v66_v15 }
  0x92   :  { %v72_v17 = vsel %vm56_vm0, %v68_v16, 0.0 }
  0x93   :  { %73 = vadd.xlane.f32.xlu1 %v72_v17 }
  0xfe   :  { %v71_v18 = vpop.xlane.xlu1 %70 }
  0xff   :  { %v75_v19 = vmul.f32 0.03125, %v71_v18 }
 0x101   :  { %v77_v20 = vadd.f32 1e-05, %v75_v19 }
 0x103   :  { %142 = vrsqrt.f32 %v77_v20  ;;  %vm85_vm2 = vweird.f32 %v77_v20 }
 0x106   :  { %v74_v21 = vpop.xlane.xlu1 %73 }
 0x107   :  { %v76_v22 = vmul.f32 0.03125, %v74_v21 }
 0x109   :  { %v143_v23 = vpop.eup %142  ;;  %v78_v24 = vadd.f32 1e-05, %v76_v22 }
 0x10a   :  { %v80_v25 = vmul.f32 %v143_v23, %v77_v20  ;;  %vm86_vm1 = vweird.f32 %v143_v23 }
 0x10b   :  { %144 = vrsqrt.f32 %v78_v24  ;;  %vm87_vm3 = vmor %vm85_vm2, %vm86_vm1  ;;  %vm95_vm5 = vweird.f32 %v78_v24 }
 0x10c   :  { %v81_v26 = vmul.f32 %v143_v23, %v80_v25 }
 0x10e   :  { %v82_v27 = vmul.f32 0.5, %v81_v26 }
 0x110   :  { %v83_v28 = vsub.f32 1.5, %v82_v27 }
 0x111   :  { %v145_v29 = vpop.eup %144 }
 0x112   :  { %v84_v30 = vmul.f32 %v143_v23, %v83_v28  ;;  %v90_v31 = vmul.f32 %v145_v29, %v78_v24  ;;  %vm96_vm4 = vweird.f32 %v145_v29 }
 0x113   :  { %vm97_vm6 = vmor %vm95_vm5, %vm96_vm4 }
 0x114   :  { %v88_v33 = vsel %vm87_vm3, %v143_v23, %v84_v30  ;;  %v91_v34 = vmul.f32 %v145_v29, %v90_v31 }
 0x115   :  { %v99_v35 = vmul.f32 %v88_v33, %v65_v10 }
 0x116   :  { %v92_v37 = vmul.f32 0.5, %v91_v34 }
 0x117   :  { %v105_v38 = vmul.f32 %v140_v32, %v99_v35 }
 0x118   :  { %v93_v39 = vsub.f32 1.5, %v92_v37 }
 0x119   :  { %v111_v40 = vadd.f32 %v141_v36, %v105_v38 }
 0x11a   :  { %v94_v41 = vmul.f32 %v145_v29, %v93_v39 }
 0x11b   :  { %113 = vst.msk [vmem:[#allocation7] sm:$0xff] %vm56_vm0, %v111_v40 }
 0x11c   :  { %v98_v42 = vsel %vm97_vm6, %v145_v29, %v94_v41 }
 0x11d   :  { %v100_v43 = vmul.f32 %v98_v42, %v66_v15 }
 0x11f   :  { %v106_v44 = vmul.f32 %v140_v32, %v100_v43 }
 0x121   :  { %v112_v45 = vadd.f32 %v141_v36, %v106_v44 }
 0x123   :  { %114 = vst.msk [vmem:[#allocation7 + $0x8] sm:$0xff] %vm56_vm0, %v112_v45 }
 0x124   :  { %127 = dma.vmem_to_hbm [thread:$0]  %s120_s29, 256, %s122_s6, [#allocation4], %s225_s23, %s225_s23, %s226_s24  }
 0x125   :  { %222 = dma.done.wait [#allocation4], 256  }
 0x126   :  { %223 = vsyncadd [#allocation4], 4294967040 }
 0x127   :  { %132 = vsyncpa [#allocation3], 1 }
 0x128   :  { %133 = vsyncpa [#allocation6], 1 }
 0x129   :  { %134 = vsyncpa [#allocation4], 1 }

</bundles_post_ra>
